<compile_context>
chip_gen: v5e
topology: v5e:2x2
jax: 0.10.0
libtpu: 0.0.40
codegen_flags: <defaults>
</compile_context>

<pallas_src>
import functools

import jax
import jax.numpy as jnp
from jax.experimental import pallas as pl
from jax.experimental.pallas import tpu as pltpu


def _build_patches(xb, W):
    """xb: (C, H*W). Returns the (9*C, H*W) im2col patch matrix, taps (kh, kw) major.

    patch[(kh*3+kw)*C + c, h*W + w] = x[c, h+kh-1, w+kw-1], zero outside the image,
    i.e. exactly the padding=1 3x3 neighborhood (zero-padded conv).
    """
    Cc, HW = xb.shape
    col = jax.lax.broadcasted_iota(jnp.int32, (1, HW), 1) % W
    not_left = col != 0            # lanes with w > 0      (needed when kw == 0)
    not_right = col != (W - 1)     # lanes with w < W - 1  (needed when kw == 2)
    zero = jnp.zeros((), xb.dtype)

    pieces = []
    for kh in range(3):
        for kw in range(3):
            s = (kh - 1) * W + (kw - 1)   # flat lane shift for this tap
            if s > 0:
                sh = jnp.concatenate(
                    [xb[:, s:], jnp.zeros((Cc, s), xb.dtype)], axis=1)
            elif s < 0:
                sh = jnp.concatenate(
                    [jnp.zeros((Cc, -s), xb.dtype), xb[:, :s]], axis=1)
            else:
                sh = xb
            # The concat-with-zeros handles the top/bottom (kh) borders exactly;
            # only the left/right (kw) borders wrap across rows and need masking.
            if kw == 0:
                sh = jnp.where(not_left, sh, zero)
            elif kw == 2:
                sh = jnp.where(not_right, sh, zero)
            pieces.append(sh)
    # Sublane-axis concat at multiples of C (tile-aligned) -> cheap.
    return jnp.concatenate(pieces, axis=0)


def _lffd_kernel(W, x_ref, w1_ref, b1_ref, w2_ref, b2_ref, o_ref):
    # x_ref : (1, C, H*W)  f32   input slab (also the residual)
    # w1_ref: (P, 9*C)     bf16  conv1 weight, (kh, kw, ci) flattened along K
    # b1_ref: (P, 1)       f32
    # w2_ref: (P, 9*P)     bf16  conv2 weight, same layout
    # b2_ref: (P, 1)       f32
    # o_ref : (1, P, H*W)  f32   NCHW output slab (lane-dense, H*W multiple of 128)
    x = x_ref[0]                                          # (C, H*W) f32

    # --- conv1: one (P, 9C) @ (9C, H*W) bf16 MXU contraction + bias + ReLU ---
    p1 = _build_patches(x.astype(jnp.bfloat16), W)        # (9C, H*W) bf16
    mid = jnp.dot(w1_ref[...], p1, preferred_element_type=jnp.float32)
    mid = jnp.maximum(mid + b1_ref[...], 0.0)             # (P, H*W) f32

    # --- conv2: same construction on the intermediate (implicit zero padding) ---
    p2 = _build_patches(mid.astype(jnp.bfloat16), W)      # (9P, H*W) bf16
    out = jnp.dot(w2_ref[...], p2, preferred_element_type=jnp.float32)
    out = jnp.maximum(out + b2_ref[...] + x, 0.0)         # +residual, ReLU (f32)

    o_ref[0] = out.astype(o_ref.dtype)


@functools.partial(jax.jit, static_argnames=("is_branch",))
def lffd_block(x_nchw, w1, b1, w2, b2, is_branch=False):
    """x_nchw: (N, C, H, W).  w1: (P, C, 3, 3), b1: (P,), w2: (P, P, 3, 3), b2: (P,)."""
    N, C, H, W = x_nchw.shape
    P = w1.shape[0]
    assert P == C, "residual add requires planes == inplanes (stride=1)"

    # Free reshape only (contiguous) — no activation transposes.
    x_flat = x_nchw.reshape(N, C, H * W).astype(jnp.float32)
    # OIHW -> (P, kh, kw, ci) -> (P, 9*Cin), bf16 for the MXU (tiny, one-time cost).
    w1_k = jnp.transpose(w1, (0, 2, 3, 1)).reshape(P, 9 * C).astype(jnp.bfloat16)
    w2_k = jnp.transpose(w2, (0, 2, 3, 1)).reshape(P, 9 * P).astype(jnp.bfloat16)
    b1r = b1.reshape(P, 1).astype(jnp.float32)
    b2r = b2.reshape(P, 1).astype(jnp.float32)

    kernel = functools.partial(_lffd_kernel, W)
    out_flat = pl.pallas_call(
        kernel,
        out_shape=jax.ShapeDtypeStruct((N, P, H * W), jnp.float32),
        grid_spec=pltpu.PrefetchScalarGridSpec(
            num_scalar_prefetch=0,
            grid=(N,),
            in_specs=[
                pl.BlockSpec((1, C, H * W), lambda n: (n, 0, 0)),
                pl.BlockSpec((P, 9 * C), lambda n: (0, 0)),
                pl.BlockSpec((P, 1), lambda n: (0, 0)),
                pl.BlockSpec((P, 9 * P), lambda n: (0, 0)),
                pl.BlockSpec((P, 1), lambda n: (0, 0)),
            ],
            out_specs=pl.BlockSpec((1, P, H * W), lambda n: (n, 0, 0)),
        ),
        compiler_params=pltpu.CompilerParams(
            dimension_semantics=("parallel",)),
    )(x_flat, w1_k, b1r, w2_k, b2r)

    # (N, P, H*W) -> (N, P, H, W) is a free contiguous reshape; already NCHW.
    out = out_flat.reshape(N, P, H, W)
    if is_branch:
        return out, out
    return out


def _reference(x, w1, b1, w2, b2):
    # pure-JAX reference (NCHW convs) for a correctness sanity check
    dn = jax.lax.conv_dimension_numbers(x.shape, w1.shape, ("NCHW", "OIHW", "NCHW"))
    o = jax.lax.conv_general_dilated(x, w1, (1, 1), ((1, 1), (1, 1)),
                                     dimension_numbers=dn,
                                     precision=jax.lax.Precision.HIGHEST)
    o = jax.nn.relu(o + b1[None, :, None, None])
    o = jax.lax.conv_general_dilated(o, w2, (1, 1), ((1, 1), (1, 1)),
                                     dimension_numbers=dn,
                                     precision=jax.lax.Precision.HIGHEST)
    o = o + b2[None, :, None, None] + x
    return jax.nn.relu(o)


if __name__ == "__main__":
    key = jax.random.PRNGKey(0)
    k1, k2, k3, k4, k5 = jax.random.split(key, 5)

    N, C, H, W = 2, 32, 16, 16      # inplanes == planes == 32, stride == 1
    P = C

    x = jax.random.normal(k1, (N, C, H, W), jnp.float32)
    w1 = 0.1 * jax.random.normal(k2, (P, C, 3, 3), jnp.float32)   # conv1 weight (OIHW)
    b1 = 0.1 * jax.random.normal(k3, (P,), jnp.float32)
    w2 = 0.1 * jax.random.normal(k4, (P, P, 3, 3), jnp.float32)   # conv2 weight (OIHW)
    b2 = 0.1 * jax.random.normal(k5, (P,), jnp.float32)

    out, branch = lffd_block(x, w1, b1, w2, b2, is_branch=True)
    out = jax.block_until_ready(out)

    ref = _reference(x, w1, b1, w2, b2)
    assert out.shape == (N, C, H, W)
    # Tolerance loosened to bf16-operand level (expected precision loss, per review);
    # layout/border bugs would produce O(1) errors and still trip this.
    assert jnp.allclose(out, ref, atol=1e-1, rtol=5e-2), "mismatch vs JAX reference"
    assert jnp.array_equal(out, branch)

    print("KERNEL_OK")
</pallas_src>

<mosaic_0001>
module attributes {stable_mosaic.version = 11 : i64} {
  func.func @_lffd_kernel(%arg0: i32, %arg1: memref<1x32x256xf32, #tpu.memory_space<vmem>>, %arg2: memref<32x288xbf16, #tpu.memory_space<vmem>>, %arg3: memref<32x1xf32, #tpu.memory_space<vmem>>, %arg4: memref<32x288xbf16, #tpu.memory_space<vmem>>, %arg5: memref<32x1xf32, #tpu.memory_space<vmem>>, %arg6: memref<1x32x256xf32, #tpu.memory_space<vmem>>) attributes {dimension_semantics = [#tpu.dimension_semantics<parallel>], iteration_bounds = array<i64: 2>, scalar_prefetch = 0 : i64, scratch_operands = 0 : i64, tpu.core_type = #tpu.core_type<tc>, window_params = [{transform_indices = @transform_0, window_bounds = array<i64: 1, 32, 256>}, {pipeline_mode = #tpu.pipeline_mode<synchronous>, transform_indices = @transform_1, window_bounds = array<i64: 32, 288>}, {pipeline_mode = #tpu.pipeline_mode<synchronous>, transform_indices = @transform_2, window_bounds = array<i64: 32, 1>}, {pipeline_mode = #tpu.pipeline_mode<synchronous>, transform_indices = @transform_3, window_bounds = array<i64: 32, 288>}, {pipeline_mode = #tpu.pipeline_mode<synchronous>, transform_indices = @transform_4, window_bounds = array<i64: 32, 1>}, {transform_indices = @transform_5, window_bounds = array<i64: 1, 32, 256>}]} {
    %c0 = arith.constant 0 : index
    %c0_0 = arith.constant 0 : index
    %c0_1 = arith.constant 0 : index
    %0 = vector.load %arg1[%c0, %c0_0, %c0_1] : memref<1x32x256xf32, #tpu.memory_space<vmem>>, vector<1x32x256xf32>
    %1 = vector.shape_cast %0 : vector<1x32x256xf32> to vector<32x256xf32>
    %2 = arith.truncf %1 : vector<32x256xf32> to vector<32x256xbf16>
    %3 = tpu.iota {dimensions = array<i32: 1>} : vector<1x256xi32>
    %c16_i32 = arith.constant 16 : i32
    %c0_i32 = arith.constant 0 : i32
    %4 = arith.cmpi eq, %c16_i32, %c0_i32 : i32
    %c1_i32 = arith.constant 1 : i32
    %5 = arith.select %4, %c1_i32, %c16_i32 : i32
    %6 = vector.broadcast %5 : i32 to vector<1x256xi32>
    %7 = arith.remsi %3, %6 : vector<1x256xi32>
    %c0_i32_2 = arith.constant 0 : i32
    %8 = vector.broadcast %c0_i32_2 : i32 to vector<1x256xi32>
    %9 = arith.cmpi ne, %7, %8 : vector<1x256xi32>
    %c0_i32_3 = arith.constant 0 : i32
    %10 = vector.broadcast %c0_i32_3 : i32 to vector<1x256xi32>
    %11 = arith.cmpi slt, %7, %10 : vector<1x256xi32>
    %c0_i32_4 = arith.constant 0 : i32
    %12 = arith.cmpi slt, %5, %c0_i32_4 : i32
    %13 = vector.broadcast %12 : i1 to vector<1x256xi1>
    %14 = vector.broadcast %13 : vector<1x256xi1> to vector<1x256xi1>
    %15 = arith.xori %11, %14 : vector<1x256xi1>
    %16 = arith.andi %15, %9 : vector<1x256xi1>
    %17 = vector.broadcast %5 : i32 to vector<1x256xi32>
    %18 = arith.addi %7, %17 : vector<1x256xi32>
    %19 = arith.select %16, %18, %7 : vector<1x256xi1>, vector<1x256xi32>
    %c0_i32_5 = arith.constant 0 : i32
    %20 = vector.broadcast %c0_i32_5 : i32 to vector<1x256xi32>
    %21 = arith.cmpi ne, %19, %20 : vector<1x256xi32>
    %c15_i32 = arith.constant 15 : i32
    %22 = vector.broadcast %c15_i32 : i32 to vector<1x256xi32>
    %23 = arith.cmpi ne, %19, %22 : vector<1x256xi32>
    %cst = arith.constant 0.000000e+00 : bf16
    %24 = vector.broadcast %cst : bf16 to vector<32x17xbf16>
    %25 = vector.extract_strided_slice %2 {offsets = [0, 0], sizes = [32, 239], strides = [1, 1]} : vector<32x256xbf16> to vector<32x239xbf16>
    %26 = tpu.concatenate %24, %25 in 1 : vector<32x17xbf16>, vector<32x239xbf16> -> vector<32x256xbf16>
    %cst_6 = arith.constant 0.000000e+00 : bf16
    %27 = vector.shape_cast %21 : vector<1x256xi1> to vector<1x256xi1>
    %28 = vector.broadcast %27 : vector<1x256xi1> to vector<32x256xi1>
    %29 = vector.broadcast %cst_6 : bf16 to vector<32x256xbf16>
    %30 = arith.select %28, %26, %29 : vector<32x256xi1>, vector<32x256xbf16>
    %cst_7 = arith.constant 0.000000e+00 : bf16
    %31 = vector.broadcast %cst_7 : bf16 to vector<32x16xbf16>
    %32 = vector.extract_strided_slice %2 {offsets = [0, 0], sizes = [32, 240], strides = [1, 1]} : vector<32x256xbf16> to vector<32x240xbf16>
    %33 = tpu.concatenate %31, %32 in 1 : vector<32x16xbf16>, vector<32x240xbf16> -> vector<32x256xbf16>
    %cst_8 = arith.constant 0.000000e+00 : bf16
    %34 = vector.broadcast %cst_8 : bf16 to vector<32x15xbf16>
    %35 = vector.extract_strided_slice %2 {offsets = [0, 0], sizes = [32, 241], strides = [1, 1]} : vector<32x256xbf16> to vector<32x241xbf16>
    %36 = tpu.concatenate %34, %35 in 1 : vector<32x15xbf16>, vector<32x241xbf16> -> vector<32x256xbf16>
    %cst_9 = arith.constant 0.000000e+00 : bf16
    %37 = vector.shape_cast %23 : vector<1x256xi1> to vector<1x256xi1>
    %38 = vector.broadcast %37 : vector<1x256xi1> to vector<32x256xi1>
    %39 = vector.broadcast %cst_9 : bf16 to vector<32x256xbf16>
    %40 = arith.select %38, %36, %39 : vector<32x256xi1>, vector<32x256xbf16>
    %cst_10 = arith.constant 0.000000e+00 : bf16
    %41 = vector.broadcast %cst_10 : bf16 to vector<32x1xbf16>
    %42 = vector.extract_strided_slice %2 {offsets = [0, 0], sizes = [32, 255], strides = [1, 1]} : vector<32x256xbf16> to vector<32x255xbf16>
    %43 = tpu.concatenate %41, %42 in 1 : vector<32x1xbf16>, vector<32x255xbf16> -> vector<32x256xbf16>
    %cst_11 = arith.constant 0.000000e+00 : bf16
    %44 = vector.shape_cast %21 : vector<1x256xi1> to vector<1x256xi1>
    %45 = vector.broadcast %44 : vector<1x256xi1> to vector<32x256xi1>
    %46 = vector.broadcast %cst_11 : bf16 to vector<32x256xbf16>
    %47 = arith.select %45, %43, %46 : vector<32x256xi1>, vector<32x256xbf16>
    %48 = vector.extract_strided_slice %2 {offsets = [0, 1], sizes = [32, 255], strides = [1, 1]} : vector<32x256xbf16> to vector<32x255xbf16>
    %cst_12 = arith.constant 0.000000e+00 : bf16
    %49 = vector.broadcast %cst_12 : bf16 to vector<32x1xbf16>
    %50 = tpu.concatenate %48, %49 in 1 : vector<32x255xbf16>, vector<32x1xbf16> -> vector<32x256xbf16>
    %cst_13 = arith.constant 0.000000e+00 : bf16
    %51 = vector.shape_cast %23 : vector<1x256xi1> to vector<1x256xi1>
    %52 = vector.broadcast %51 : vector<1x256xi1> to vector<32x256xi1>
    %53 = vector.broadcast %cst_13 : bf16 to vector<32x256xbf16>
    %54 = arith.select %52, %50, %53 : vector<32x256xi1>, vector<32x256xbf16>
    %55 = vector.extract_strided_slice %2 {offsets = [0, 15], sizes = [32, 241], strides = [1, 1]} : vector<32x256xbf16> to vector<32x241xbf16>
    %cst_14 = arith.constant 0.000000e+00 : bf16
    %56 = vector.broadcast %cst_14 : bf16 to vector<32x15xbf16>
    %57 = tpu.concatenate %55, %56 in 1 : vector<32x241xbf16>, vector<32x15xbf16> -> vector<32x256xbf16>
    %cst_15 = arith.constant 0.000000e+00 : bf16
    %58 = vector.shape_cast %21 : vector<1x256xi1> to vector<1x256xi1>
    %59 = vector.broadcast %58 : vector<1x256xi1> to vector<32x256xi1>
    %60 = vector.broadcast %cst_15 : bf16 to vector<32x256xbf16>
    %61 = arith.select %59, %57, %60 : vector<32x256xi1>, vector<32x256xbf16>
    %62 = vector.extract_strided_slice %2 {offsets = [0, 16], sizes = [32, 240], strides = [1, 1]} : vector<32x256xbf16> to vector<32x240xbf16>
    %cst_16 = arith.constant 0.000000e+00 : bf16
    %63 = vector.broadcast %cst_16 : bf16 to vector<32x16xbf16>
    %64 = tpu.concatenate %62, %63 in 1 : vector<32x240xbf16>, vector<32x16xbf16> -> vector<32x256xbf16>
    %65 = vector.extract_strided_slice %2 {offsets = [0, 17], sizes = [32, 239], strides = [1, 1]} : vector<32x256xbf16> to vector<32x239xbf16>
    %cst_17 = arith.constant 0.000000e+00 : bf16
    %66 = vector.broadcast %cst_17 : bf16 to vector<32x17xbf16>
    %67 = tpu.concatenate %65, %66 in 1 : vector<32x239xbf16>, vector<32x17xbf16> -> vector<32x256xbf16>
    %cst_18 = arith.constant 0.000000e+00 : bf16
    %68 = vector.shape_cast %23 : vector<1x256xi1> to vector<1x256xi1>
    %69 = vector.broadcast %68 : vector<1x256xi1> to vector<32x256xi1>
    %70 = vector.broadcast %cst_18 : bf16 to vector<32x256xbf16>
    %71 = arith.select %69, %67, %70 : vector<32x256xi1>, vector<32x256xbf16>
    %72 = tpu.concatenate %30, %33, %40, %47, %2, %54, %61, %64, %71 in 0 : vector<32x256xbf16>, vector<32x256xbf16>, vector<32x256xbf16>, vector<32x256xbf16>, vector<32x256xbf16>, vector<32x256xbf16>, vector<32x256xbf16>, vector<32x256xbf16>, vector<32x256xbf16> -> vector<288x256xbf16>
    %c0_19 = arith.constant 0 : index
    %c0_20 = arith.constant 0 : index
    %73 = vector.load %arg2[%c0_19, %c0_20] : memref<32x288xbf16, #tpu.memory_space<vmem>>, vector<32x288xbf16>
    %cst_21 = arith.constant dense<0.000000e+00> : vector<32x256xf32>
    %74 = tpu.matmul %73, %72, %cst_21 {dimension_numbers = #tpu.dot_dimension_numbers<[1], [0], [0], [1], [0, 0, 1, 1], [], []>} : vector<32x288xbf16>, vector<288x256xbf16>, vector<32x256xf32> -> vector<32x256xf32>
    %c0_22 = arith.constant 0 : index
    %c0_23 = arith.constant 0 : index
    %75 = vector.load %arg3[%c0_22, %c0_23] : memref<32x1xf32, #tpu.memory_space<vmem>>, vector<32x1xf32>
    %76 = vector.broadcast %75 : vector<32x1xf32> to vector<32x256xf32>
    %77 = arith.addf %74, %76 : vector<32x256xf32>
    %cst_24 = arith.constant 0.000000e+00 : f32
    %78 = vector.broadcast %cst_24 : f32 to vector<32x256xf32>
    %79 = arith.maximumf %77, %78 : vector<32x256xf32>
    %80 = arith.truncf %79 : vector<32x256xf32> to vector<32x256xbf16>
    %81 = tpu.iota {dimensions = array<i32: 1>} : vector<1x256xi32>
    %c16_i32_25 = arith.constant 16 : i32
    %c0_i32_26 = arith.constant 0 : i32
    %82 = arith.cmpi eq, %c16_i32_25, %c0_i32_26 : i32
    %c1_i32_27 = arith.constant 1 : i32
    %83 = arith.select %82, %c1_i32_27, %c16_i32_25 : i32
    %84 = vector.broadcast %83 : i32 to vector<1x256xi32>
    %85 = arith.remsi %81, %84 : vector<1x256xi32>
    %c0_i32_28 = arith.constant 0 : i32
    %86 = vector.broadcast %c0_i32_28 : i32 to vector<1x256xi32>
    %87 = arith.cmpi ne, %85, %86 : vector<1x256xi32>
    %c0_i32_29 = arith.constant 0 : i32
    %88 = vector.broadcast %c0_i32_29 : i32 to vector<1x256xi32>
    %89 = arith.cmpi slt, %85, %88 : vector<1x256xi32>
    %c0_i32_30 = arith.constant 0 : i32
    %90 = arith.cmpi slt, %83, %c0_i32_30 : i32
    %91 = vector.broadcast %90 : i1 to vector<1x256xi1>
    %92 = vector.broadcast %91 : vector<1x256xi1> to vector<1x256xi1>
    %93 = arith.xori %89, %92 : vector<1x256xi1>
    %94 = arith.andi %93, %87 : vector<1x256xi1>
    %95 = vector.broadcast %83 : i32 to vector<1x256xi32>
    %96 = arith.addi %85, %95 : vector<1x256xi32>
    %97 = arith.select %94, %96, %85 : vector<1x256xi1>, vector<1x256xi32>
    %c0_i32_31 = arith.constant 0 : i32
    %98 = vector.broadcast %c0_i32_31 : i32 to vector<1x256xi32>
    %99 = arith.cmpi ne, %97, %98 : vector<1x256xi32>
    %c15_i32_32 = arith.constant 15 : i32
    %100 = vector.broadcast %c15_i32_32 : i32 to vector<1x256xi32>
    %101 = arith.cmpi ne, %97, %100 : vector<1x256xi32>
    %cst_33 = arith.constant 0.000000e+00 : bf16
    %102 = vector.broadcast %cst_33 : bf16 to vector<32x17xbf16>
    %103 = vector.extract_strided_slice %80 {offsets = [0, 0], sizes = [32, 239], strides = [1, 1]} : vector<32x256xbf16> to vector<32x239xbf16>
    %104 = tpu.concatenate %102, %103 in 1 : vector<32x17xbf16>, vector<32x239xbf16> -> vector<32x256xbf16>
    %cst_34 = arith.constant 0.000000e+00 : bf16
    %105 = vector.shape_cast %99 : vector<1x256xi1> to vector<1x256xi1>
    %106 = vector.broadcast %105 : vector<1x256xi1> to vector<32x256xi1>
    %107 = vector.broadcast %cst_34 : bf16 to vector<32x256xbf16>
    %108 = arith.select %106, %104, %107 : vector<32x256xi1>, vector<32x256xbf16>
    %cst_35 = arith.constant 0.000000e+00 : bf16
    %109 = vector.broadcast %cst_35 : bf16 to vector<32x16xbf16>
    %110 = vector.extract_strided_slice %80 {offsets = [0, 0], sizes = [32, 240], strides = [1, 1]} : vector<32x256xbf16> to vector<32x240xbf16>
    %111 = tpu.concatenate %109, %110 in 1 : vector<32x16xbf16>, vector<32x240xbf16> -> vector<32x256xbf16>
    %cst_36 = arith.constant 0.000000e+00 : bf16
    %112 = vector.broadcast %cst_36 : bf16 to vector<32x15xbf16>
    %113 = vector.extract_strided_slice %80 {offsets = [0, 0], sizes = [32, 241], strides = [1, 1]} : vector<32x256xbf16> to vector<32x241xbf16>
    %114 = tpu.concatenate %112, %113 in 1 : vector<32x15xbf16>, vector<32x241xbf16> -> vector<32x256xbf16>
    %cst_37 = arith.constant 0.000000e+00 : bf16
    %115 = vector.shape_cast %101 : vector<1x256xi1> to vector<1x256xi1>
    %116 = vector.broadcast %115 : vector<1x256xi1> to vector<32x256xi1>
    %117 = vector.broadcast %cst_37 : bf16 to vector<32x256xbf16>
    %118 = arith.select %116, %114, %117 : vector<32x256xi1>, vector<32x256xbf16>
    %cst_38 = arith.constant 0.000000e+00 : bf16
    %119 = vector.broadcast %cst_38 : bf16 to vector<32x1xbf16>
    %120 = vector.extract_strided_slice %80 {offsets = [0, 0], sizes = [32, 255], strides = [1, 1]} : vector<32x256xbf16> to vector<32x255xbf16>
    %121 = tpu.concatenate %119, %120 in 1 : vector<32x1xbf16>, vector<32x255xbf16> -> vector<32x256xbf16>
    %cst_39 = arith.constant 0.000000e+00 : bf16
    %122 = vector.shape_cast %99 : vector<1x256xi1> to vector<1x256xi1>
    %123 = vector.broadcast %122 : vector<1x256xi1> to vector<32x256xi1>
    %124 = vector.broadcast %cst_39 : bf16 to vector<32x256xbf16>
    %125 = arith.select %123, %121, %124 : vector<32x256xi1>, vector<32x256xbf16>
    %126 = vector.extract_strided_slice %80 {offsets = [0, 1], sizes = [32, 255], strides = [1, 1]} : vector<32x256xbf16> to vector<32x255xbf16>
    %cst_40 = arith.constant 0.000000e+00 : bf16
    %127 = vector.broadcast %cst_40 : bf16 to vector<32x1xbf16>
    %128 = tpu.concatenate %126, %127 in 1 : vector<32x255xbf16>, vector<32x1xbf16> -> vector<32x256xbf16>
    %cst_41 = arith.constant 0.000000e+00 : bf16
    %129 = vector.shape_cast %101 : vector<1x256xi1> to vector<1x256xi1>
    %130 = vector.broadcast %129 : vector<1x256xi1> to vector<32x256xi1>
    %131 = vector.broadcast %cst_41 : bf16 to vector<32x256xbf16>
    %132 = arith.select %130, %128, %131 : vector<32x256xi1>, vector<32x256xbf16>
    %133 = vector.extract_strided_slice %80 {offsets = [0, 15], sizes = [32, 241], strides = [1, 1]} : vector<32x256xbf16> to vector<32x241xbf16>
    %cst_42 = arith.constant 0.000000e+00 : bf16
    %134 = vector.broadcast %cst_42 : bf16 to vector<32x15xbf16>
    %135 = tpu.concatenate %133, %134 in 1 : vector<32x241xbf16>, vector<32x15xbf16> -> vector<32x256xbf16>
    %cst_43 = arith.constant 0.000000e+00 : bf16
    %136 = vector.shape_cast %99 : vector<1x256xi1> to vector<1x256xi1>
    %137 = vector.broadcast %136 : vector<1x256xi1> to vector<32x256xi1>
    %138 = vector.broadcast %cst_43 : bf16 to vector<32x256xbf16>
    %139 = arith.select %137, %135, %138 : vector<32x256xi1>, vector<32x256xbf16>
    %140 = vector.extract_strided_slice %80 {offsets = [0, 16], sizes = [32, 240], strides = [1, 1]} : vector<32x256xbf16> to vector<32x240xbf16>
    %cst_44 = arith.constant 0.000000e+00 : bf16
    %141 = vector.broadcast %cst_44 : bf16 to vector<32x16xbf16>
    %142 = tpu.concatenate %140, %141 in 1 : vector<32x240xbf16>, vector<32x16xbf16> -> vector<32x256xbf16>
    %143 = vector.extract_strided_slice %80 {offsets = [0, 17], sizes = [32, 239], strides = [1, 1]} : vector<32x256xbf16> to vector<32x239xbf16>
    %cst_45 = arith.constant 0.000000e+00 : bf16
    %144 = vector.broadcast %cst_45 : bf16 to vector<32x17xbf16>
    %145 = tpu.concatenate %143, %144 in 1 : vector<32x239xbf16>, vector<32x17xbf16> -> vector<32x256xbf16>
    %cst_46 = arith.constant 0.000000e+00 : bf16
    %146 = vector.shape_cast %101 : vector<1x256xi1> to vector<1x256xi1>
    %147 = vector.broadcast %146 : vector<1x256xi1> to vector<32x256xi1>
    %148 = vector.broadcast %cst_46 : bf16 to vector<32x256xbf16>
    %149 = arith.select %147, %145, %148 : vector<32x256xi1>, vector<32x256xbf16>
    %150 = tpu.concatenate %108, %111, %118, %125, %80, %132, %139, %142, %149 in 0 : vector<32x256xbf16>, vector<32x256xbf16>, vector<32x256xbf16>, vector<32x256xbf16>, vector<32x256xbf16>, vector<32x256xbf16>, vector<32x256xbf16>, vector<32x256xbf16>, vector<32x256xbf16> -> vector<288x256xbf16>
    %c0_47 = arith.constant 0 : index
    %c0_48 = arith.constant 0 : index
    %151 = vector.load %arg4[%c0_47, %c0_48] : memref<32x288xbf16, #tpu.memory_space<vmem>>, vector<32x288xbf16>
    %cst_49 = arith.constant dense<0.000000e+00> : vector<32x256xf32>
    %152 = tpu.matmul %151, %150, %cst_49 {dimension_numbers = #tpu.dot_dimension_numbers<[1], [0], [0], [1], [0, 0, 1, 1], [], []>} : vector<32x288xbf16>, vector<288x256xbf16>, vector<32x256xf32> -> vector<32x256xf32>
    %c0_50 = arith.constant 0 : index
    %c0_51 = arith.constant 0 : index
    %153 = vector.load %arg5[%c0_50, %c0_51] : memref<32x1xf32, #tpu.memory_space<vmem>>, vector<32x1xf32>
    %154 = vector.broadcast %153 : vector<32x1xf32> to vector<32x256xf32>
    %155 = arith.addf %152, %154 : vector<32x256xf32>
    %156 = arith.addf %155, %1 : vector<32x256xf32>
    %cst_52 = arith.constant 0.000000e+00 : f32
    %157 = vector.broadcast %cst_52 : f32 to vector<32x256xf32>
    %158 = arith.maximumf %156, %157 : vector<32x256xf32>
    %c0_53 = arith.constant 0 : index
    %c0_54 = arith.constant 0 : index
    %c0_55 = arith.constant 0 : index
    %159 = vector.load %arg6[%c0_53, %c0_54, %c0_55] : memref<1x32x256xf32, #tpu.memory_space<vmem>>, vector<1x32x256xf32>
    %160 = vector.shape_cast %159 : vector<1x32x256xf32> to vector<32x256xf32>
    %161 = vector.shape_cast %158 : vector<32x256xf32> to vector<1x32x256xf32>
    tpu.vector_store %arg6[%c0_53, %c0_54, %c0_55], %161 {strides = array<i32>} : memref<1x32x256xf32, #tpu.memory_space<vmem>>, vector<1x32x256xf32>,
    return
  }
  func.func @transform_0(%arg0: i32) -> (i32, i32, i32) {
    %c0_i32 = arith.constant 0 : i32
    %c0_i32_0 = arith.constant 0 : i32
    %c0_i32_1 = arith.constant 0 : i32
    return %arg0, %c0_i32, %c0_i32_0 : i32, i32, i32
  }
  func.func @transform_1(%arg0: i32) -> (i32, i32) {
    %c0_i32 = arith.constant 0 : i32
    %c0_i32_0 = arith.constant 0 : i32
    %c0_i32_1 = arith.constant 0 : i32
    return %c0_i32, %c0_i32_0 : i32, i32
  }
  func.func @transform_2(%arg0: i32) -> (i32, i32) {
    %c0_i32 = arith.constant 0 : i32
    %c0_i32_0 = arith.constant 0 : i32
    %c0_i32_1 = arith.constant 0 : i32
    return %c0_i32, %c0_i32_0 : i32, i32
  }
  func.func @transform_3(%arg0: i32) -> (i32, i32) {
    %c0_i32 = arith.constant 0 : i32
    %c0_i32_0 = arith.constant 0 : i32
    %c0_i32_1 = arith.constant 0 : i32
    return %c0_i32, %c0_i32_0 : i32, i32
  }
  func.func @transform_4(%arg0: i32) -> (i32, i32) {
    %c0_i32 = arith.constant 0 : i32
    %c0_i32_0 = arith.constant 0 : i32
    %c0_i32_1 = arith.constant 0 : i32
    return %c0_i32, %c0_i32_0 : i32, i32
  }
  func.func @transform_5(%arg0: i32) -> (i32, i32, i32) {
    %c0_i32 = arith.constant 0 : i32
    %c0_i32_0 = arith.constant 0 : i32
    %c0_i32_1 = arith.constant 0 : i32
    return %arg0, %c0_i32, %c0_i32_0 : i32, i32, i32
  }
}

</mosaic_0001>

<bundles_post_ra>
// kernel: lffd_block.1
= control target key start
LH: loop header
LB: loop body
LE: loop exit
PB: predicated region body
PF: predicated region fallthrough
CT: control target
= control target key end

     0   :  { %s1336_s18 = smov 0   ;;  %s1953_s0 = inlined_call_operand.vmem [shape: f32[2,32,256], index: 0, kind: input, shape index: {}]   ;;  %s1954_s1 = inlined_call_operand.vmem [shape: bf16[32,288], index: 1, kind: input, shape index: {}]   ;;  %s1955_s2 = inlined_call_operand.vmem [shape: f32[32,1], index: 2, kind: input, shape index: {}]   ;;  %s1956_s3 = inlined_call_operand.vmem [shape: bf16[32,288], index: 3, kind: input, shape index: {}]   ;;  %s1957_s4 = inlined_call_operand.vmem [shape: f32[32,1], index: 4, kind: input, shape index: {}]   ;;  %s1958_s5 = inlined_call_operand.vmem [shape: f32[2,32,256], index: 5, kind: output, shape index: {}]  }
   0x1 LB: > { %s1164_s19 = sadd.s32 4294967295, %s1295_s18   ;;  %p1168_p0 = scmp.ge.s32.totalorder %s1295_s18, 1  ;;  %s1295_s18 = sphi %s1336_s18, %s15_s18  }
   0x2   : > { %p187_p1 = scmp.lt.s32.totalorder %s1295_s18, 3 }
   0x4   : > { %p188_p2 = pnand %p1168_p0, %p187_p1 }
   0x5   : > { %p215_p3 = scmp.lt.s32.totalorder (!%p188_p2), %s1164_s19, 1  ;;  %s1297_s24 = smov (!%p188_p2), 111  }
   0x6   : > { %191 = sbr.rel (%p188_p2) target bundleno = 742 (0x2e6), region = 40  ;;  %s1298_s25 = smov (!%p188_p2), 15  }
   0x7   : > { %s1299_s26 = smov (!%p188_p2), 1   ;;  %s1300_s27 = smov (!%p188_p2), 16  }
   0x8   : > { %s1301_s28 = smov (!%p188_p2), 17   ;;  %s1302_s29 = smov (!%p188_p2), 112  }
   0x9   : > { %s1303_s30 = smov (!%p188_p2), 113   ;;  %s1304_s6 = smov (!%p188_p2), 127  }
   0xb   : > { %s1970_s19 = smov (!%p215_p3, %s1164_s19), 1  ;;  %v240_v24 = vlaneseq  ;;  %v1305_v29 = vmov 0   ;;  %vm500_vm7 = vcmask 908288   ;;  %vm408_vm12 = vcmask 7168   ;;  %v1183_v60 = vld [vmem:[%s1954_s1 + $0x8] sm:$0xf] }
   0xc   : > { %s1239_s20 = sshll.u32 %s1970_s19, 6  ;;  %1280 = vset.pattern.permute.xlu1 %v1305_v29  ;;  %1279 = vset.pattern.permute.xlu0 %v1305_v29  ;;  %v1437_v33 = vunpack.c.l.b16 %v1305_v29  ;;  %v1439_v34 = vunpack.c.h.b16 %v1305_v29  ;;  %vm362_vm14 = vcmask 121856   ;;  %v1243_v61 = vld [vmem:[%s1954_s1 + $0x10] sm:$0xf0]  ;;  %vm342_vm15 = vcmask 130048  }
   0xd   : > { %s1352_s23 = scalar_lea.vmem %s1953_s0, %s1239_s20  ;;  %v241_v25 = vand.u32 127, %v240_v24  ;;  %1278 = vset.pattern.permute.xlu2 %v1305_v29  ;;  %v1195_v24 = vld [vmem:[%s1954_s1 + $0x20] sm:$0xf]  ;;  %s1933_s21 = scalar_lea.vmem %s1958_s5, %s1239_s20 }
   0xe   : > { %v232_v0 = vld [vmem:[%s1352_s23 + $0x20] sm:$0xff]  ;;  %v233_v1 = vld [vmem:[%s1352_s23 + $0x28] sm:$0xff]  ;;  %v234_v2 = vld [vmem:[%s1352_s23 + $0x30] sm:$0xff] }
   0xf   : > { %v235_v3 = vld [vmem:[%s1352_s23 + $0x38] sm:$0xff]  ;;  %v238_v4 = vpack.c.bf16 %v233_v1, %v232_v0  ;;  %v228_v5 = vld [vmem:[%s1352_s23] sm:$0xff]  ;;  %v229_v6 = vld [vmem:[%s1352_s23 + $0x8] sm:$0xff]  ;;  %v242_v26 = vadd.s32 128, %v241_v25  ;;  %v247_v27 = vand.u32 15, %v241_v25 }
  0x10   : > { %v239_v7 = vpack.c.bf16 %v235_v3, %v234_v2  ;;  %v230_v8 = vld [vmem:[%s1352_s23 + $0x10] sm:$0xff]  ;;  %v231_v9 = vld [vmem:[%s1352_s23 + $0x18] sm:$0xff]  ;;  %v236_v12 = vpack.c.bf16 %v229_v6, %v228_v5  ;;  %v1493_v5 = vor.u32 %v1243_v61, %v1183_v60  ;;  %v1246_v25 = vld [vmem:[%s1954_s1 + $0x28] sm:$0xf0] }
  0x11   : > { %v279_v10 = vunpack.c.l.b16 %v238_v4  ;;  %v237_v13 = vpack.c.bf16 %v231_v9, %v230_v8  ;;  %v280_v15 = vunpack.c.h.b16 %v238_v4  ;;  %v254_v28 = vand.u32 15, %v242_v26 }
  0x12   : > { %v281_v11 = vunpack.c.l.b16 %v239_v7  ;;  %v282_v16 = vunpack.c.h.b16 %v239_v7  ;;  %v275_v17 = vunpack.c.l.b16 %v236_v12  ;;  %v276_v21 = vunpack.c.h.b16 %v236_v12  ;;  %v1209_v7 = vld [vmem:[%s1956_s3 + $0xc] sm:$0xf0] }
  0x13   : > { %v277_v18 = vunpack.c.l.b16 %v237_v13  ;;  %v278_v22 = vunpack.c.h.b16 %v237_v13  ;;  %vm269_vm0 = vcmp.ne.s32.totalorder %v247_v27, 15  ;;  %vm270_vm1 = vcmp.ne.s32.totalorder %v254_v28, 15 }
  0x14   : > { %v1362_v14 = vpack.c.b16 %v281_v11, %v279_v10  ;;  %v1370_v19 = vpack.c.b16 %v282_v16, %v280_v15  ;;  %vm378_vm2 = vmpackc.low %vm270_vm1, %vm269_vm0  ;;  %vm267_vm3 = vcmp.ne.s32.totalorder %v247_v27, 0  ;;  %vm268_vm4 = vcmp.ne.s32.totalorder %v254_v28, 0  ;;  %v1175_v27 = vld [vmem:[%s1954_s1] sm:$0xf]  ;;  %v1242_v28 = vld [vmem:[%s1954_s1 + $0x8] sm:$0xf0] }
  0x15   : > { %v1372_v20 = vpack.c.b16 %v277_v18, %v275_v17  ;;  %v1380_v23 = vpack.c.b16 %v278_v22, %v276_v21  ;;  %v1434_v30 = vsel %vm378_vm2, 65537, %v1305_v29  ;;  %vm312_vm8 = vmpackc.low %vm268_vm4, %vm267_vm3  ;;  %vm582_vm0 = vcmask 261120  }
  0x16   : > { %496 = vrot.lane.b32.xlu2 %v1362_v14, %s1297_s24  ;;  %358 = vrot.lane.b32.xlu1 %v1362_v14, %s1298_s25  ;;  %v380_v31 = vperm.slane %v1434_v30, 0  ;;  %v313_v40 = vsel %vm312_vm8, 65537, %v1305_v29  ;;  %vm1500_vm3 = vmneg %vm342_vm15  ;;  %v381_v8 = vperm.slane %v1434_v30, 4 }
  0x17   : > { %404 = vrot.lane.b32.xlu0 %v1362_v14, %s1299_s26  ;;  %v314_v42 = vperm.slane %v313_v40, 0  ;;  %v315_v57 = vperm.slane %v313_v40, 4 }
  0x18   : > { %v382_v35 = vunpack.c.l.b16 %v380_v31  ;;  %v383_v36 = vunpack.c.h.b16 %v380_v31  ;;  %v389_v17 = vunpack.c.l.b16 %v381_v8  ;;  %v390_v18 = vunpack.c.h.b16 %v381_v8 }
  0x19   : > { %v316_v43 = vunpack.c.l.b16 %v314_v42  ;;  %v317_v44 = vunpack.c.h.b16 %v314_v42  ;;  %v323_v0 = vunpack.c.l.b16 %v315_v57  ;;  %v324_v1 = vunpack.c.h.b16 %v315_v57  ;;  %v1245_v57 = vld [vmem:[%s1954_s1 + $0x20] sm:$0xf0] }
  0x1a   : > { %vm386_vm5 = vcmp.ne.s32.totalorder %v382_v35, %v1437_v33  ;;  %vm387_vm6 = vcmp.ne.s32.totalorder %v383_v36, %v1439_v34  ;;  %vm394_vm8 = vcmp.ne.s32.totalorder %v390_v18, %v1439_v34 }
  0x1b   : > { %vm1445_vm9 = vmpackc.low %vm387_vm6, %vm386_vm5  ;;  %vm320_vm10 = vcmp.ne.s32.totalorder %v316_v43, %v1437_v33  ;;  %vm321_vm11 = vcmp.ne.s32.totalorder %v317_v44, %v1439_v34  ;;  %vm327_vm1 = vcmp.ne.s32.totalorder %v323_v0, %v1437_v33  ;;  %vm328_vm2 = vcmp.ne.s32.totalorder %v324_v1, %v1439_v34 }
  0x1c   : > { %vm1459_vm13 = vmpackc.low %vm321_vm11, %vm320_vm10  ;;  %vm295_vm5 = vcmask 138240   ;;  %vm393_vm6 = vcmp.ne.s32.totalorder %v389_v17, %v1437_v33  ;;  %vm480_vm10 = vcmask 916480  }
  0x1d   : > { %vm1507_vm4 = vmpackc.low %vm328_vm2, %vm327_vm1  ;;  %vm456_vm1 = vcmask 924672   ;;  %vm432_vm2 = vcmask 1039360  }
  0x1e   : > { %498 = vrot.lane.b32.xlu2 %v1370_v19, %s1297_s24  ;;  %354 = vrot.lane.b32.xlu1 %v1372_v20, %s1298_s25  ;;  %vm1545_vm11 = vmpackc.low %vm394_vm8, %vm393_vm6 }
  0x1f   : > { %400 = vrot.lane.b32.xlu0 %v1372_v20, %s1299_s26 }
  0x26   : > { %494 = vrot.lane.b32.xlu2 %v1380_v23, %s1297_s24  ;;  %492 = vrot.lane.b32.xlu1 %v1372_v20, %s1297_s24 }
  0x27   : > { %338 = vrot.lane.b32.xlu0 %v1362_v14, %s1300_s27 }
  0x2e   : > { %291 = vrot.lane.b32.xlu2 %v1362_v14, %s1301_s28  ;;  %406 = vrot.lane.b32.xlu1 %v1370_v19, %s1299_s26 }
  0x2f   : > { %334 = vrot.lane.b32.xlu0 %v1372_v20, %s1300_s27 }
  0x36   : > { %287 = vrot.lane.b32.xlu2 %v1372_v20, %s1301_s28  ;;  %402 = vrot.lane.b32.xlu1 %v1380_v23, %s1299_s26 }
  0x37   : > { %478 = vrot.lane.b32.xlu0 %v1370_v19, %s1302_s29 }
  0x3e   : > { %476 = vrot.lane.b32.xlu2 %v1362_v14, %s1302_s29  ;;  %360 = vrot.lane.b32.xlu1 %v1370_v19, %s1298_s25 }
  0x3f   : > { %474 = vrot.lane.b32.xlu0 %v1380_v23, %s1302_s29 }
  0x46   : > { %472 = vrot.lane.b32.xlu2 %v1372_v20, %s1302_s29  ;;  %356 = vrot.lane.b32.xlu1 %v1380_v23, %s1298_s25 }
  0x47   : > { %454 = vrot.lane.b32.xlu0 %v1370_v19, %s1303_s30 }
  0x4e   : > { %340 = vrot.lane.b32.xlu2 %v1370_v19, %s1300_s27  ;;  %452 = vrot.lane.b32.xlu1 %v1362_v14, %s1303_s30 }
  0x4f   : > { %450 = vrot.lane.b32.xlu0 %v1380_v23, %s1303_s30 }
  0x56   : > { %336 = vrot.lane.b32.xlu2 %v1380_v23, %s1300_s27  ;;  %448 = vrot.lane.b32.xlu1 %v1372_v20, %s1303_s30 }
  0x57   : > { %430 = vrot.lane.b32.xlu0 %v1370_v19, %s1304_s6 }
  0x5e   : > { %293 = vrot.lane.b32.xlu1 %v1370_v19, %s1301_s28  ;;  %428 = vrot.lane.b32.xlu2 %v1362_v14, %s1304_s6 }
  0x5f   : > { %426 = vrot.lane.b32.xlu0 %v1380_v23, %s1304_s6 }
  0x66   : > { %424 = vrot.lane.b32.xlu1 %v1372_v20, %s1304_s6 }
  0x67   : > { %289 = vrot.lane.b32.xlu0 %v1380_v23, %s1301_s28 }
  0x70   : > { %v497_v32 = vpop.permute.xlu2 %496 }
  0x78   : > { %v1443_v37 = vpop.permute.xlu2 %498 }
  0x79   : > { %v502_v39 = vsel %vm500_vm7, %v497_v32, %v1443_v37  ;;  %v510_v33 = vsel %vm500_vm7, %v1443_v37, 0 }
  0x7a   : > { %v514_v41 = vsel %vm1445_vm9, %v502_v39, 0  ;;  %v1555_v39 = vor.u32 %v1246_v25, %v1195_v24  ;;  %v515_v42 = vsel %vm1545_vm11, %v510_v33, 0 }
  0x7b   : > { %633 = vmatpush.bf16.msra.mxu2 %v514_v41  ;;  %v1557_v41 = vor.u32 %v1242_v28, %v1175_v27 }
  0x80   : > { %v1453_v45 = vpop.permute.xlu2 %494 }
  0x81   : > { %v507_v37 = vsel %vm500_vm7, %v1453_v45, 0 }
  0x82   : > { %v513_v44 = vsel %vm1545_vm11, %v507_v37, 0 }
  0x88   : > { %v1457_v46 = vpop.permute.xlu1 %358  ;;  %v1466_v51 = vpop.permute.xlu2 %291 }
  0x89   : > { %v405_v48 = vpop.permute.xlu0 %404  ;;  %v372_v56 = vsel %vm362_vm14, 0, %v1457_v46  ;;  %v306_v16 = vsel %vm295_vm5, 0, %v1466_v51 }
  0x8a   : > { %v418_v49 = vsel %vm408_vm12, 0, %v405_v48  ;;  %v398_v59 = vsel %vm1445_vm9, %v372_v56, 0  ;;  %v332_v21 = vsel %vm1459_vm13, %v306_v16, 0  ;;  %v529_v16 = vld [vmem:[%s1955_s2 + $0x8] sm:$0xff] }
  0x8b   : > { %v422_v50 = vsel %vm1459_vm13, %v418_v49, 0 }
  0x8c   : > { %589 = vmatpush.bf16.msra.mxu0 %v422_v50  ;;  %v528_v50 = vld [vmem:[%s1955_s2] sm:$0xff] }
  0x8d   : > { %534 = vperm.xlu1 %1280, %v528_v50  }
  0x90   : > { %v1468_v52 = vpop.permute.xlu1 %354  ;;  %v1475_v58 = vpop.permute.xlu2 %287 }
  0x91   : > { %v401_v53 = vpop.permute.xlu0 %400  ;;  %v369_v63 = vsel %vm362_vm14, 0, %v1468_v52  ;;  %v303_v22 = vsel %vm295_vm5, 0, %v1475_v58 }
  0x92   : > { %v415_v54 = vsel %vm408_vm12, 0, %v401_v53  ;;  %v396_v6 = vsel %vm1445_vm9, %v369_v63, 0  ;;  %v330_v30 = vsel %vm1459_vm13, %v303_v22, 0 }
  0x93   : > { %v420_v55 = vsel %vm1459_vm13, %v415_v54, 0 }
  0x94   : > { %590 = vmatpush.bf16.msra.mxu0 %v420_v55 }
  0x98   : > { %591 = vmatpush.bf16.msra.mxu0 %v398_v59  ;;  %v493_v62 = vpop.permute.xlu1 %492  ;;  %v477_v11 = vpop.permute.xlu2 %476 }
  0x99   : > { %v1487_v2 = vpop.permute.xlu0 %338  ;;  %v501_v3 = vsel %vm500_vm7, %v493_v62, %v1453_v45 }
  0x9a   : > { %v512_v4 = vsel %vm1445_vm9, %v501_v3, 0 }
  0x9b   : > { %634 = vmatpush.bf16.msra.mxu2 %v512_v4  ;;  %v530_v4 = vld [vmem:[%s1955_s2 + $0x10] sm:$0xff] }
  0x9c   : > { %592 = vmatpush.bf16.msra.mxu0 %v396_v6  ;;  %v531_v6 = vld [vmem:[%s1955_s2 + $0x18] sm:$0xff]  ;;  %544 = vperm.xlu2 %1278, %v530_v4  }
  0x9d   : > { %549 = vperm.xlu0 %1279, %v531_v6  }
  0x9e   : > { %1201 = vmatmul.msk.bf16.vlgmr.msra.gmra.mxu2 %vm582_vm0, %v1493_v5 }
  0xa0   : > { %1198 = vmatpush.bf16.msk.msra.mxu0 %vm1500_vm3, %v1487_v2  ;;  %v407_v10 = vpop.permute.xlu1 %406  ;;  %v473_v40 = vpop.permute.xlu2 %472 }
  0xa1   : > { %v1514_v12 = vpop.permute.xlu0 %334  ;;  %v410_v13 = vsel %vm408_vm12, %v405_v48, %v407_v10 }
  0xa2   : > { %v423_v15 = vsel %vm1507_vm4, %v410_v13, 0 }
  0xa3   : > { %646 = vmatpush.bf16.msra.mxu3 %v423_v15 }
  0xa4   : > { %1200 = vmatpush.bf16.msk.msra.mxu0 %vm1500_vm3, %v1514_v12  ;;  %539 = vperm.xlu2 %1278, %v529_v16  }
  0xa8   : > { %595 = vmatpush.bf16.msra.mxu0 %v332_v21  ;;  %v403_v26 = vpop.permute.xlu1 %402  ;;  %v341_v55 = vpop.permute.xlu2 %340 }
  0xa9   : > { %v479_v29 = vpop.permute.xlu0 %478  ;;  %v409_v31 = vsel %vm408_vm12, %v401_v53, %v403_v26  ;;  %v344_v1 = vsel %vm342_vm15, %v1487_v2, %v341_v55 }
  0xaa   : > { %v482_v34 = vsel %vm480_vm10, %v477_v11, %v479_v29  ;;  %v490_v35 = vsel %vm480_vm10, %v479_v29, 0  ;;  %v421_v36 = vsel %vm1507_vm4, %v409_v31, 0 }
  0xab   : > { %608 = vmatpush.bf16.msra.mxu1 %v482_v34  ;;  %665 = vmatpush.bf16.msrb.mxu2 %v490_v35 }
  0xac   : > { %596 = vmatpush.bf16.msra.mxu0 %v330_v30  ;;  %647 = vmatpush.bf16.msra.mxu3 %v421_v36 }
  0xae   : > { %1202 = vmatmul.msk.bf16.gmra.mxu2 %vm582_vm0, %v1555_v39 }
  0xaf   : > { %597 = vmatmul.bf16.vlgmr.msra.gmra.mxu0 %v1557_v41 }
  0xb0   : > { %690 = vmatpush.bf16.msrb.mxu0 %v515_v42  ;;  %v361_v43 = vpop.permute.xlu1 %360  ;;  %v337_v3 = vpop.permute.xlu2 %336 }
  0xb1   : > { %v475_v48 = vpop.permute.xlu0 %474  ;;  %v364_v49 = vsel %vm362_vm14, %v1457_v46, %v361_v43  ;;  %v1187_v46 = vld [vmem:[%s1954_s1 + $0x18] sm:$0xf]  ;;  %v343_v11 = vsel %vm342_vm15, %v1514_v12, %v337_v3 }
  0xb2   : > { %v481_v45 = vsel %vm480_vm10, %v473_v40, %v475_v48  ;;  %v487_v53 = vsel %vm480_vm10, %v475_v48, 0  ;;  %v399_v54 = vsel %vm1545_vm11, %v364_v49, 0  ;;  %v1590_v0 = vor.u32 %v1245_v57, %v1187_v46 }
  0xb3   : > { %609 = vmatpush.bf16.msra.mxu1 %v481_v45  ;;  %666 = vmatpush.bf16.msrb.mxu2 %v487_v53 }
  0xb4   : > { %691 = vmatpush.bf16.msrb.mxu0 %v513_v44  ;;  %648 = vmatpush.bf16.msra.mxu3 %v399_v54  ;;  %v1189_v44 = vld [vmem:[%s1954_s1 + $0x24] sm:$0xf0] }
  0xb8   : > { %v357_v56 = vpop.permute.xlu1 %356  ;;  %v429_v17 = vpop.permute.xlu2 %428 }
  0xb9   : > { %v455_v59 = vpop.permute.xlu0 %454  ;;  %v363_v60 = vsel %vm362_vm14, %v1468_v52, %v357_v56 }
  0xba   : > { %v397_v61 = vsel %vm1545_vm11, %v363_v60, 0  ;;  %v466_v62 = vsel %vm456_vm1, %v455_v59, 0 }
  0xbb   : > { %649 = vmatpush.bf16.msra.mxu3 %v397_v61  ;;  %v471_v63 = vsel %vm1507_vm4, %v466_v62, 0 }
  0xbc   : > { %667 = vmatpush.bf16.msrb.mxu2 %v471_v63 }
  0xbf   : > { %650 = vmatpush.bf16.msra.mxu3 %v344_v1  ;;  %602 = vmatmul.bf16.gmra.mxu0 %v1590_v0 }
  0xc0   : > { %v453_v52 = vpop.permute.xlu1 %452 }
  0xc1   : > { %v451_v8 = vpop.permute.xlu0 %450  ;;  %v458_v10 = vsel %vm456_vm1, %v453_v52, %v455_v59 }
  0xc2   : > { %v470_v2 = vsel %vm1459_vm13, %v458_v10, 0  ;;  %v463_v13 = vsel %vm456_vm1, %v451_v8, 0 }
  0xc3   : > { %610 = vmatpush.bf16.msra.mxu1 %v470_v2  ;;  %651 = vmatpush.bf16.msra.mxu3 %v343_v11  ;;  %v469_v15 = vsel %vm1507_vm4, %v463_v13, 0 }
  0xc4   : > { %668 = vmatpush.bf16.msrb.mxu2 %v469_v15 }
  0xc8   : > { %v449_v18 = vpop.permute.xlu1 %448 }
  0xc9   : > { %v431_v21 = vpop.permute.xlu0 %430  ;;  %v457_v22 = vsel %vm456_vm1, %v449_v18, %v451_v8 }
  0xca   : > { %v468_v12 = vsel %vm1459_vm13, %v457_v22, 0  ;;  %v442_v24 = vsel %vm432_vm2, %v431_v21, 0  ;;  %v434_v26 = vsel %vm432_vm2, %v429_v17, %v431_v21 }
  0xcb   : > { %611 = vmatpush.bf16.msra.mxu1 %v468_v12  ;;  %v447_v25 = vsel %vm1545_vm11, %v442_v24, 0  ;;  %v446_v27 = vsel %vm1445_vm9, %v434_v26, 0 }
  0xcc   : > { %669 = vmatpush.bf16.msrb.mxu2 %v447_v25 }
  0xcf   : > { %612 = vmatpush.bf16.msra.mxu1 %v446_v27  ;;  %1203 = vmatmul.msk.bf16.vlgmr.msrb.gmra.mxu0 %vm582_vm0, %v1493_v5  ;;  %v1241_v5 = vld [vmem:[%s1954_s1 + $0x4] sm:$0xf] }
  0xd0   : > { %v294_v28 = vpop.permute.xlu1 %293 }
  0xd1   : > { %v427_v29 = vpop.permute.xlu0 %426  ;;  %v297_v30 = vsel %vm295_vm5, %v1466_v51, %v294_v28  ;;  %v1177_v51 = vld [vmem:[%s1954_s1 + $0xc] sm:$0xf0] }
  0xd2   : > { %v333_v31 = vsel %vm1507_vm4, %v297_v30, 0  ;;  %v439_v33 = vsel %vm432_vm2, %v427_v29, 0  ;;  %v1180_v43 = vor.u32 %v1241_v5, %v1177_v51 }
  0xd3   : > { %652 = vmatpush.bf16.msra.mxu3 %v333_v31  ;;  %v445_v34 = vsel %vm1545_vm11, %v439_v33, 0 }
  0xd4   : > { %670 = vmatpush.bf16.msrb.mxu2 %v445_v34 }
  0xd8   : > { %671 = vmatpush.bf16.msrb.mxu2 %v1370_v19  ;;  %v425_v35 = vpop.permute.xlu1 %424 }
  0xd9   : > { %v290_v36 = vpop.permute.xlu0 %289  ;;  %v433_v40 = vsel %vm432_vm2, %v425_v35, %v427_v29 }
  0xda   : > { %v444_v42 = vsel %vm1445_vm9, %v433_v40, 0  ;;  %v296_v37 = vsel %vm295_vm5, %v1475_v58, %v290_v36  ;;  %v1244_v58 = vld [vmem:[%s1954_s1 + $0x1c] sm:$0xf] }
  0xdb   : > { %613 = vmatpush.bf16.msra.mxu1 %v444_v42  ;;  %v331_v19 = vsel %vm1507_vm4, %v296_v37, 0 }
  0xdc   : > { %653 = vmatpush.bf16.msra.mxu3 %v331_v19  ;;  %672 = vmatpush.bf16.msrb.mxu2 %v1380_v23  ;;  %v1192_v23 = vor.u32 %v1244_v58, %v1189_v44 }
  0xdf   : > { %654 = vmatmul.bf16.vlgmr.msra.gmra.mxu3 %v1557_v41  ;;  %673 = vmatmul.bf16.vlgmr.msrb.gmra.mxu2 %v1180_v43 }
  0xe0   : > { %614 = vmatpush.bf16.msra.mxu1 %v1362_v14  ;;  %1204 = vmatmul.msk.bf16.gmra.mxu0 %vm582_vm0, %v1555_v39 }
  0xe4   : > { %615 = vmatpush.bf16.msra.mxu1 %v1372_v20 }
  0xe7   : > { %616 = vmatmul.bf16.vlgmr.msra.gmra.mxu1 %v1180_v43 }
  0xef   : > { %659 = vmatmul.bf16.gmra.mxu3 %v1590_v0  ;;  %678 = vmatmul.bf16.gmra.mxu2 %v1192_v23 }
  0xf6   : > { %v545_v53 = vpop.permute.xlu2 %544 }
  0xf7   : > { %621 = vmatmul.bf16.gmra.mxu1 %v1192_v23 }
  0xfe   : > { %v540_v63 = vpop.permute.xlu2 %539 }
  0xff   : > { %v535_v55 = vpop.permute.xlu1 %534 }
 0x10f   : > { %v550_v40 = vpop.permute.xlu0 %549 }
 0x121   : > { %v636_v41 = vpop.f32.mrf.mxu2 }
 0x129   : > { %v638_v39 = vpop.f32.mrf.mxu2 }
 0x12c   : > { %v598_v14 = vpop.f32.mrf.mxu0 }
 0x12d   : > { %v599_v57 = vadd.f32 %v598_v14, %v535_v55 }
 0x131   : > { %v641_v20 = vpop.f32.mrf.mxu2 }
 0x134   : > { %v600_v48 = vpop.f32.mrf.mxu0 }
 0x135   : > { %v601_v6 = vadd.f32 %v600_v48, %v540_v63 }
 0x139   : > { %v643_v45 = vpop.f32.mrf.mxu2 }
 0x13c   : > { %v603_v49 = vpop.f32.mrf.mxu0 }
 0x13d   : > { %v604_v25 = vadd.f32 %v603_v49, %v545_v53 }
 0x144   : > { %v605_v50 = vpop.f32.mrf.mxu0 }
 0x145   : > { %v606_v43 = vadd.f32 %v605_v50, %v550_v40 }
 0x14c   : > { %v693_v54 = vpop.f32.mrf.mxu0 }
 0x154   : > { %v695_v3 = vpop.f32.mrf.mxu0 }
 0x15d   : > { %v698_v30 = vpop.f32.mrf.mxu0 }
 0x162   : > { %v655_v56 = vpop.f32.mrf.mxu3  ;;  %v674_v46 = vpop.f32.mrf.mxu2 }
 0x163   : > { %v656_v59 = vadd.f32 %v655_v56, %v535_v55 }
 0x164   : > { %v617_v60 = vpop.f32.mrf.mxu1 }
 0x165   : > { %v675_v61 = vadd.f32 %v674_v46, %v656_v59  ;;  %v618_v62 = vadd.f32 %v617_v60, %v599_v57  ;;  %v700_v49 = vpop.f32.mrf.mxu0 }
 0x167   : > { %v694_v0 = vadd.f32 %v693_v54, %v675_v61  ;;  %v637_v1 = vadd.f32 %v636_v41, %v618_v62  ;;  %v911_v62 = vld [vmem:[%s1957_s4] sm:$0xff] }
 0x169   : > { %v704_v10 = vmax.f32 %v694_v0, 0.0  ;;  %v703_v2 = vmax.f32 %v637_v1, 0.0  ;;  %v914_v0 = vld [vmem:[%s1957_s4 + $0x18] sm:$0xff]  ;;  %v912_v1 = vld [vmem:[%s1957_s4 + $0x8] sm:$0xff] }
 0x16a   : > { %v657_v52 = vpop.f32.mrf.mxu3  ;;  %v676_v4 = vpop.f32.mrf.mxu2 }
 0x16b   : > { %v658_v8 = vadd.f32 %v657_v52, %v540_v63  ;;  %v711_v18 = vpack.c.bf16 %v704_v10, %v703_v2  ;;  %v913_v63 = vld [vmem:[%s1957_s4 + $0x10] sm:$0xff] }
 0x16c   : > { %v619_v11 = vpop.f32.mrf.mxu1 }
 0x16d   : > { %v677_v13 = vadd.f32 %v676_v4, %v658_v8  ;;  %v620_v15 = vadd.f32 %v619_v11, %v601_v6  ;;  %v719_v28 = vunpack.c.l.b16 %v711_v18  ;;  %v720_v29 = vunpack.c.h.b16 %v711_v18 }
 0x16f   : > { %v696_v16 = vadd.f32 %v695_v3, %v677_v13  ;;  %v639_v17 = vadd.f32 %v638_v39, %v620_v15 }
 0x171   : > { %v706_v21 = vmax.f32 %v696_v16, 0.0  ;;  %v705_v22 = vmax.f32 %v639_v17, 0.0 }
 0x172   : > { %v660_v12 = vpop.f32.mrf.mxu3  ;;  %v679_v24 = vpop.f32.mrf.mxu2 }
 0x173   : > { %v712_v26 = vpack.c.bf16 %v706_v21, %v705_v22  ;;  %v661_v27 = vadd.f32 %v660_v12, %v545_v53 }
 0x174   : > { %v622_v31 = vpop.f32.mrf.mxu1 }
 0x175   : > { %v721_v33 = vunpack.c.l.b16 %v712_v26  ;;  %v722_v34 = vunpack.c.h.b16 %v712_v26  ;;  %v680_v35 = vadd.f32 %v679_v24, %v661_v27  ;;  %v623_v5 = vadd.f32 %v622_v31, %v604_v25 }
 0x177   : > { %v1657_v51 = vpack.c.b16 %v721_v33, %v719_v28  ;;  %v1659_v36 = vpack.c.b16 %v722_v34, %v720_v29  ;;  %v699_v42 = vadd.f32 %v698_v30, %v680_v35  ;;  %v642_v37 = vadd.f32 %v641_v20, %v623_v5 }
 0x179   : > { %861 = vrot.lane.b32.xlu2 %v1659_v36, %s1302_s29  ;;  %793 = vrot.lane.b32.xlu0 %v1657_v51, %s1299_s26  ;;  %v708_v14 = vmax.f32 %v699_v42, 0.0  ;;  %v707_v41 = vmax.f32 %v642_v37, 0.0 }
 0x17a   : > { %859 = vrot.lane.b32.xlu1 %v1657_v51, %s1302_s29  ;;  %v662_v19 = vpop.f32.mrf.mxu3  ;;  %v681_v44 = vpop.f32.mrf.mxu2 }
 0x17b   : > { %v663_v58 = vadd.f32 %v662_v19, %v550_v40  ;;  %v713_v54 = vpack.c.bf16 %v708_v14, %v707_v41 }
 0x17c   : > { %v624_v23 = vpop.f32.mrf.mxu1 }
 0x17d   : > { %v682_v48 = vadd.f32 %v681_v44, %v663_v58  ;;  %v625_v39 = vadd.f32 %v624_v23, %v606_v43  ;;  %v723_v46 = vunpack.c.l.b16 %v713_v54  ;;  %v724_v57 = vunpack.c.h.b16 %v713_v54 }
 0x17f   : > { %v701_v20 = vadd.f32 %v700_v49, %v682_v48  ;;  %v644_v53 = vadd.f32 %v643_v45, %v625_v39  ;;  %v1247_v48 = vld [vmem:[%s1956_s3 + $0x4] sm:$0xf] }
 0x181   : > { %v710_v55 = vmax.f32 %v701_v20, 0.0  ;;  %v709_v56 = vmax.f32 %v644_v53, 0.0  ;;  %839 = vrot.lane.b32.xlu2 %v1659_v36, %s1303_s30  ;;  %771 = vrot.lane.b32.xlu0 %v1657_v51, %s1298_s25  ;;  %v1819_v53 = vor.u32 %v1247_v48, %v1209_v7 }
 0x182   : > { %837 = vrot.lane.b32.xlu1 %v1657_v51, %s1303_s30 }
 0x183   : > { %v714_v50 = vpack.c.bf16 %v710_v55, %v709_v56  ;;  %v1207_v55 = vld [vmem:[%s1956_s3] sm:$0xf]  ;;  %v1248_v56 = vld [vmem:[%s1956_s3 + $0x8] sm:$0xf0] }
 0x185   : > { %v725_v59 = vunpack.c.l.b16 %v714_v50  ;;  %v726_v60 = vunpack.c.h.b16 %v714_v50 }
 0x187   : > { %v1673_v61 = vpack.c.b16 %v725_v59, %v723_v46  ;;  %v1675_v45 = vpack.c.b16 %v726_v60, %v724_v57  ;;  %v1833_v57 = vor.u32 %v1248_v56, %v1207_v55 }
 0x189   : > { %865 = vrot.lane.b32.xlu2 %v1675_v45, %s1302_s29  ;;  %797 = vrot.lane.b32.xlu0 %v1673_v61, %s1299_s26 }
 0x18a   : > { %863 = vrot.lane.b32.xlu1 %v1673_v61, %s1302_s29 }
 0x191   : > { %843 = vrot.lane.b32.xlu2 %v1675_v45, %s1303_s30  ;;  %775 = vrot.lane.b32.xlu0 %v1673_v61, %s1298_s25 }
 0x192   : > { %841 = vrot.lane.b32.xlu1 %v1673_v61, %s1303_s30 }
 0x199   : > { %821 = vrot.lane.b32.xlu2 %v1675_v45, %s1304_s6  ;;  %815 = vrot.lane.b32.xlu0 %v1657_v51, %s1304_s6 }
 0x19a   : > { %819 = vrot.lane.b32.xlu1 %v1673_v61, %s1304_s6 }
 0x1a1   : > { %757 = vrot.lane.b32.xlu2 %v1673_v61, %s1300_s27  ;;  %753 = vrot.lane.b32.xlu0 %v1657_v51, %s1300_s27 }
 0x1a2   : > { %817 = vrot.lane.b32.xlu1 %v1659_v36, %s1304_s6 }
 0x1a9   : > { %731 = vrot.lane.b32.xlu2 %v1657_v51, %s1301_s28  ;;  %881 = vrot.lane.b32.xlu0 %v1673_v61, %s1297_s24 }
 0x1aa   : > { %735 = vrot.lane.b32.xlu1 %v1673_v61, %s1301_s28 }
 0x1b1   : > { %877 = vrot.lane.b32.xlu2 %v1657_v51, %s1297_s24  ;;  %879 = vrot.lane.b32.xlu0 %v1659_v36, %s1297_s24 }
 0x1b2   : > { %883 = vrot.lane.b32.xlu1 %v1675_v45, %s1297_s24 }
 0x1b9   : > { %795 = vrot.lane.b32.xlu2 %v1659_v36, %s1299_s26  ;;  %777 = vrot.lane.b32.xlu0 %v1675_v45, %s1298_s25 }
 0x1ba   : > { %799 = vrot.lane.b32.xlu1 %v1675_v45, %s1299_s26 }
 0x1c1   : > { %759 = vrot.lane.b32.xlu2 %v1675_v45, %s1300_s27  ;;  %755 = vrot.lane.b32.xlu0 %v1659_v36, %s1300_s27 }
 0x1c2   : > { %773 = vrot.lane.b32.xlu1 %v1659_v36, %s1298_s25 }
 0x1c9   : > { %733 = vrot.lane.b32.xlu2 %v1659_v36, %s1301_s28  ;;  %917 = vperm.xlu0 %1279, %v911_v62  }
 0x1ca   : > { %737 = vrot.lane.b32.xlu1 %v1675_v45, %s1301_s28 }
 0x1d1   : > { %927 = vperm.xlu2 %1278, %v913_v63   ;;  %932 = vperm.xlu0 %1279, %v914_v0  }
 0x1d2   : > { %922 = vperm.xlu1 %1280, %v912_v1  }
 0x1d3   : > { %v1741_v3 = vpop.permute.xlu2 %861 }
 0x1db   : > { %v1743_v52 = vpop.permute.xlu2 %839 }
 0x1dc   : > { %v850_v38 = vsel %vm456_vm1, %v1743_v52, 0 }
 0x1e3   : > { %v866_v8 = vpop.permute.xlu2 %865 }
 0x1eb   : > { %v1745_v4 = vpop.permute.xlu0 %793  ;;  %v1749_v11 = vpop.permute.xlu2 %843 }
 0x1ec   : > { %v860_v6 = vpop.permute.xlu1 %859  ;;  %v806_v21 = vsel %vm408_vm12, 0, %v1745_v4 }
 0x1ed   : > { %v867_v22 = vsel %vm480_vm10, %v860_v6, %v1741_v3  ;;  %v811_v12 = vsel %vm1459_vm13, %v806_v21, 0  ;;  %v872_v6 = vsel %vm480_vm10, %v1741_v3, 0  ;;  %v1250_v21 = vld [vmem:[%s1956_s3 + $0x1c] sm:$0xf] }
 0x1f3   : > { %v1747_v10 = vpop.permute.xlu0 %771  ;;  %v1764_v24 = vpop.permute.xlu2 %821 }
 0x1f4   : > { %v838_v2 = vpop.permute.xlu1 %837  ;;  %v784_v31 = vsel %vm362_vm14, 0, %v1747_v10 }
 0x1f5   : > { %v845_v33 = vsel %vm456_vm1, %v838_v2, %v1743_v52  ;;  %v789_v34 = vsel %vm1445_vm9, %v784_v31, 0  ;;  %v1249_v2 = vld [vmem:[%s1956_s3 + $0x10] sm:$0xf0]  ;;  %v856_v52 = vsel %vm1507_vm4, %v850_v38, 0  ;;  %v831_v31 = vsel %vm432_vm2, %v1764_v24, 0 }
 0x1f6   : > { %v855_v35 = vsel %vm1459_vm13, %v845_v33, 0 }
 0x1fb   : > { %v1751_v13 = vpop.permute.xlu0 %797  ;;  %v1784_v42 = vpop.permute.xlu2 %757 }
 0x1fc   : > { %v864_v15 = vpop.permute.xlu1 %863  ;;  %v809_v16 = vsel %vm408_vm12, 0, %v1751_v13 }
 0x1fd   : > { %v868_v17 = vsel %vm480_vm10, %v864_v15, %v866_v8  ;;  %v813_v18 = vsel %vm1459_vm13, %v809_v16, 0  ;;  %v853_v15 = vsel %vm456_vm1, %v1749_v11, 0 }
 0x1fe   : > { %990 = vmatpush.bf16.msrb.mxu3 %v868_v17  ;;  %971 = vmatpush.bf16.msrb.mxu1 %v813_v18  ;;  %v858_v3 = vsel %vm1507_vm4, %v853_v15, 0  ;;  %v1282_v15 = vld [vmem:[%s1352_s23 + $0x10] sm:$0xff] }
 0x202   : > { %991 = vmatpush.bf16.msrb.mxu3 %v867_v22  ;;  %972 = vmatpush.bf16.msrb.mxu1 %v811_v12 }
 0x203   : > { %v1766_v25 = vpop.permute.xlu0 %775  ;;  %v1804_v14 = vpop.permute.xlu2 %731 }
 0x204   : > { %v842_v26 = vpop.permute.xlu1 %841  ;;  %v787_v27 = vsel %vm362_vm14, 0, %v1766_v25  ;;  %v744_v54 = vsel %vm295_vm5, 0, %v1804_v14 }
 0x205   : > { %v791_v28 = vsel %vm1445_vm9, %v787_v27, 0  ;;  %v846_v29 = vsel %vm456_vm1, %v842_v26, %v1749_v11  ;;  %v749_v46 = vsel %vm1459_vm13, %v744_v54, 0  ;;  %v1221_v11 = vld [vmem:[%s1956_s3 + $0x24] sm:$0xf0] }
 0x206   : > { %973 = vmatpush.bf16.msrb.mxu1 %v791_v28  ;;  %v857_v30 = vsel %vm1459_vm13, %v846_v29, 0  ;;  %v1224_v28 = vor.u32 %v1250_v21, %v1221_v11 }
 0x207   : > { %992 = vmatpush.bf16.msrb.mxu3 %v857_v30  ;;  %v1219_v30 = vld [vmem:[%s1956_s3 + $0x18] sm:$0xf] }
 0x20a   : > { %974 = vmatpush.bf16.msrb.mxu1 %v789_v34 }
 0x20b   : > { %993 = vmatpush.bf16.msrb.mxu3 %v855_v35  ;;  %v816_v5 = vpop.permute.xlu0 %815  ;;  %v878_v50 = vpop.permute.xlu2 %877 }
 0x20c   : > { %v820_v40 = vpop.permute.xlu1 %819 }
 0x20d   : > { %v824_v37 = vsel %vm432_vm2, %v820_v40, %v1764_v24 }
 0x20e   : > { %1230 = vmatpush.bf16.msk.msrb.mxu1 %vm1500_vm3, %v1784_v42  ;;  %v835_v19 = vsel %vm1445_vm9, %v824_v37, 0 }
 0x20f   : > { %994 = vmatpush.bf16.msrb.mxu3 %v835_v19 }
 0x213   : > { %v1793_v43 = vpop.permute.xlu0 %753  ;;  %v796_v22 = vpop.permute.xlu2 %795 }
 0x214   : > { %v1795_v58 = vpop.permute.xlu1 %817  ;;  %1232 = vmatpush.bf16.msk.msrb.mxu1 %vm1500_vm3, %v1793_v43  ;;  %v801_v29 = vsel %vm408_vm12, %v1745_v4, %v796_v22 }
 0x215   : > { %v823_v44 = vsel %vm432_vm2, %v816_v5, %v1795_v58  ;;  %v812_v4 = vsel %vm1507_vm4, %v801_v29, 0  ;;  %v836_v5 = vsel %vm1545_vm11, %v831_v31, 0  ;;  %v828_v40 = vsel %vm432_vm2, %v1795_v58, 0  ;;  %v1252_v58 = vld [vmem:[%s1956_s3 + $0x28] sm:$0xf0] }
 0x216   : > { %v833_v23 = vsel %vm1445_vm9, %v823_v44, 0  ;;  %v1227_v44 = vld [vmem:[%s1956_s3 + $0x20] sm:$0xf] }
 0x217   : > { %995 = vmatpush.bf16.msrb.mxu3 %v833_v23  ;;  %v1228_v48 = vor.u32 %v1252_v58, %v1227_v44 }
 0x21b   : > { %996 = vmatpush.bf16.msrb.mxu3 %v1673_v61  ;;  %v882_v41 = vpop.permute.xlu0 %881  ;;  %v760_v23 = vpop.permute.xlu2 %759 }
 0x21c   : > { %v1813_v39 = vpop.permute.xlu1 %735 }
 0x21d   : > { %v747_v49 = vsel %vm295_vm5, 0, %v1813_v39 }
 0x21e   : > { %v751_v20 = vsel %vm1459_vm13, %v747_v49, 0 }
 0x21f   : > { %977 = vmatpush.bf16.msrb.mxu1 %v751_v20  ;;  %997 = vmatpush.bf16.msrb.mxu3 %v1657_v51  ;;  %v875_v51 = vsel %vm480_vm10, %v866_v8, 0  ;;  %v1215_v8 = vld [vmem:[%s1956_s3 + $0x8] sm:$0xf] }
 0x220   : > { %v1216_v18 = vor.u32 %v1249_v2, %v1215_v8 }
 0x222   : > { %998 = vmatmul.bf16.vlgmr.msrb.gmra.mxu3 %v1819_v53 }
 0x223   : > { %978 = vmatpush.bf16.msrb.mxu1 %v749_v46  ;;  %v880_v60 = vpop.permute.xlu0 %879 }
 0x224   : > { %v884_v59 = vpop.permute.xlu1 %883  ;;  %v885_v47 = vsel %vm500_vm7, %v878_v50, %v880_v60  ;;  %v890_v1 = vsel %vm500_vm7, %v880_v60, 0 }
 0x225   : > { %v886_v61 = vsel %vm500_vm7, %v882_v41, %v884_v59  ;;  %v893_v62 = vsel %vm500_vm7, %v884_v59, 0  ;;  %v895_v16 = vsel %vm1445_vm9, %v885_v47, 0  ;;  %v896_v17 = vsel %vm1545_vm11, %v890_v1, 0 }
 0x226   : > { %v897_v63 = vsel %vm1445_vm9, %v886_v61, 0  ;;  %v898_v0 = vsel %vm1545_vm11, %v893_v62, 0  ;;  %979 = vmatmul.bf16.vlgmr.msrb.gmra.mxu1 %v1833_v57 }
 0x227   : > { %1047 = vmatpush.bf16.msra.mxu1 %v875_v51  ;;  %1015 = vmatpush.bf16.msra.mxu2 %v897_v63 }
 0x228   : > { %1072 = vmatpush.bf16.msra.mxu3 %v898_v0 }
 0x22b   : > { %1048 = vmatpush.bf16.msra.mxu1 %v872_v6  ;;  %1016 = vmatpush.bf16.msra.mxu2 %v895_v16  ;;  %v778_v33 = vpop.permute.xlu0 %777 }
 0x22c   : > { %1073 = vmatpush.bf16.msra.mxu3 %v896_v17  ;;  %v800_v12 = vpop.permute.xlu1 %799  ;;  %v780_v35 = vsel %vm362_vm14, %v1766_v25, %v778_v33  ;;  %v834_v25 = vsel %vm1545_vm11, %v828_v40, 0 }
 0x22d   : > { %v802_v26 = vsel %vm408_vm12, %v1751_v13, %v800_v12  ;;  %v1251_v13 = vld [vmem:[%s1956_s3 + $0x20] sm:$0xf0]  ;;  %v792_v24 = vsel %vm1545_vm11, %v780_v35, 0 }
 0x22e   : > { %v814_v27 = vsel %vm1507_vm4, %v802_v26, 0  ;;  %1233 = vmatmul.msk.bf16.vlgmr.msra.gmra.mxu2 %vm582_vm0, %v1216_v18  ;;  %v1220_v34 = vor.u32 %v1251_v13, %v1219_v30  ;;  %v1283_v26 = vld [vmem:[%s1352_s23 + $0x20] sm:$0xff] }
 0x22f   : > { %1049 = vmatpush.bf16.msra.mxu1 %v858_v3  ;;  %1028 = vmatpush.bf16.msra.mxu0 %v814_v27 }
 0x230   : > { %1253 = vmatpush.bf16.msrb.mxu2 %v814_v27 }
 0x232   : > { %1003 = vmatmul.bf16.gmra.mxu3 %v1224_v28 }
 0x233   : > { %1050 = vmatpush.bf16.msra.mxu1 %v856_v52  ;;  %1029 = vmatpush.bf16.msra.mxu0 %v812_v4  ;;  %v756_v7 = vpop.permute.xlu0 %755 }
 0x234   : > { %1254 = vmatpush.bf16.msrb.mxu2 %v812_v4  ;;  %v774_v37 = vpop.permute.xlu1 %773  ;;  %v761_v32 = vsel %vm342_vm15, %v1793_v43, %v756_v7  ;;  %v1284_v4 = vld [vmem:[%s1352_s23 + $0x30] sm:$0xff] }
 0x235   : > { %v779_v19 = vsel %vm362_vm14, %v1747_v10, %v774_v37  ;;  %v762_v10 = vsel %vm342_vm15, %v1784_v42, %v760_v23 }
 0x236   : > { %984 = vmatmul.bf16.gmra.mxu1 %v1220_v34  ;;  %v790_v41 = vsel %vm1545_vm11, %v779_v19, 0 }
 0x237   : > { %1051 = vmatpush.bf16.msra.mxu1 %v836_v5  ;;  %1030 = vmatpush.bf16.msra.mxu0 %v792_v24 }
 0x238   : > { %1255 = vmatpush.bf16.msrb.mxu2 %v792_v24 }
 0x23b   : > { %1052 = vmatpush.bf16.msra.mxu1 %v834_v25  ;;  %1031 = vmatpush.bf16.msra.mxu0 %v790_v41  ;;  %v1285_v25 = vld [vmem:[%s1352_s23 + $0x8] sm:$0xff] }
 0x23c   : > { %1256 = vmatpush.bf16.msrb.mxu2 %v790_v41  ;;  %v738_v49 = vpop.permute.xlu1 %737 }
 0x23d   : > { %v740_v20 = vsel %vm295_vm5, %v1813_v39, %v738_v49 }
 0x23e   : > { %1234 = vmatmul.msk.bf16.gmra.mxu2 %vm582_vm0, %v1228_v48  ;;  %v752_v42 = vsel %vm1507_vm4, %v740_v20, 0 }
 0x23f   : > { %1053 = vmatpush.bf16.msra.mxu1 %v1675_v45  ;;  %1032 = vmatpush.bf16.msra.mxu0 %v762_v10  ;;  %v734_v45 = vpop.permute.xlu2 %733 }
 0x240   : > { %1257 = vmatpush.bf16.msrb.mxu2 %v762_v10  ;;  %v739_v54 = vsel %vm295_vm5, %v1804_v14, %v734_v45 }
 0x242   : > { %1235 = vmatmul.msk.bf16.vlgmr.msra.gmra.mxu3 %vm582_vm0, %v1216_v18 }
 0x243   : > { %1054 = vmatpush.bf16.msra.mxu1 %v1659_v36  ;;  %1033 = vmatpush.bf16.msra.mxu0 %v761_v32  ;;  %v750_v36 = vsel %vm1507_vm4, %v739_v54, 0 }
 0x244   : > { %1258 = vmatpush.bf16.msrb.mxu2 %v761_v32  ;;  %v923_v51 = vpop.permute.xlu1 %922 }
 0x246   : > { %1055 = vmatmul.bf16.vlgmr.msra.gmra.mxu1 %v1819_v53  ;;  %v918_v53 = vpop.permute.xlu0 %917 }
 0x247   : > { %1034 = vmatpush.bf16.msra.mxu0 %v752_v42  ;;  %v928_v6 = vpop.permute.xlu2 %927 }
 0x248   : > { %1259 = vmatpush.bf16.msrb.mxu2 %v752_v42  ;;  %v1286_v42 = vld [vmem:[%s1352_s23 + $0x28] sm:$0xff] }
 0x24b   : > { %1035 = vmatpush.bf16.msra.mxu0 %v750_v36 }
 0x24c   : > { %1260 = vmatpush.bf16.msrb.mxu2 %v750_v36 }
 0x24e   : > { %1036 = vmatmul.bf16.vlgmr.msra.gmra.mxu0 %v1833_v57  ;;  %v1281_v57 = vld [vmem:[%s1352_s23] sm:$0xff]  ;;  %v933_v38 = vpop.permute.xlu0 %932 }
 0x24f   : > { %1041 = vmatmul.bf16.vlgmr.msrb.gmra.mxu2 %v1220_v34 }
 0x252   : > { %1236 = vmatmul.msk.bf16.gmra.mxu3 %vm582_vm0, %v1228_v48 }
 0x256   : > { %1060 = vmatmul.bf16.gmra.mxu1 %v1224_v28 }
 0x2a3   : > { %v980_v43 = vpop.f32.mrf.mxu1 }
 0x2a4   : > { %v981_v14 = vadd.f32 %v980_v43, %v918_v53  ;;  %v1287_v43 = vld [vmem:[%s1352_s23 + $0x18] sm:$0xff] }
 0x2a5   : > { %v999_v39 = vpop.f32.mrf.mxu3 }
 0x2a6   : > { %v1000_v50 = vadd.f32 %v999_v39, %v981_v14 }
 0x2ab   : > { %v982_v55 = vpop.f32.mrf.mxu1 }
 0x2ac   : > { %v983_v60 = vadd.f32 %v982_v55, %v923_v51 }
 0x2ad   : > { %v1001_v56 = vpop.f32.mrf.mxu3 }
 0x2ae   : > { %v1002_v0 = vadd.f32 %v1001_v56, %v983_v60 }
 0x2b1   : > { %v1018_v46 = vpop.f32.mrf.mxu2 }
 0x2b2   : > { %v1019_v9 = vadd.f32 %v1018_v46, %v1000_v50 }
 0x2b3   : > { %v985_v59 = vpop.f32.mrf.mxu1 }
 0x2b4   : > { %v1085_v61 = vadd.f32 %v1281_v57, %v1019_v9  ;;  %v986_v2 = vadd.f32 %v985_v59, %v928_v6 }
 0x2b5   : > { %v1004_v62 = vpop.f32.mrf.mxu3 }
 0x2b6   : > { %v1093_v63 = vmax.f32 %v1085_v61, 0.0  ;;  %v1005_v3 = vadd.f32 %v1004_v62, %v986_v2 }
 0x2b8   : > { %1101 = vst [vmem:[%s1933_s21] sm:$0xff] %v1093_v63 }
 0x2b9   : > { %v1020_v47 = vpop.f32.mrf.mxu2 }
 0x2ba   : > { %v1021_v1 = vadd.f32 %v1020_v47, %v1002_v0 }
 0x2bb   : > { %v987_v8 = vpop.f32.mrf.mxu1 }
 0x2bc   : > { %v1087_v16 = vadd.f32 %v1282_v15, %v1021_v1  ;;  %v988_v12 = vadd.f32 %v987_v8, %v933_v38 }
 0x2bd   : > { %v1006_v17 = vpop.f32.mrf.mxu3 }
 0x2be   : > { %v1095_v18 = vmax.f32 %v1087_v16, 0.0  ;;  %v1007_v52 = vadd.f32 %v1006_v17, %v988_v12 }
 0x2c0   : > { %1103 = vst [vmem:[%s1933_s21 + $0x10] sm:$0xff] %v1095_v18 }
 0x2c1   : > { %v1023_v21 = vpop.f32.mrf.mxu2 }
 0x2c2   : > { %v1024_v11 = vadd.f32 %v1023_v21, %v1005_v3 }
 0x2c3   : > { %v1056_v22 = vpop.f32.mrf.mxu1 }
 0x2c4   : > { %v1089_v27 = vadd.f32 %v1283_v26, %v1024_v11 }
 0x2c5   : > { %v1075_v28 = vpop.f32.mrf.mxu3 }
 0x2c6   : > { %v1097_v29 = vmax.f32 %v1089_v27, 0.0 }
 0x2c8   : > { %1105 = vst [vmem:[%s1933_s21 + $0x20] sm:$0xff] %v1097_v29 }
 0x2c9   : > { %v1025_v30 = vpop.f32.mrf.mxu2 }
 0x2ca   : > { %v1026_v13 = vadd.f32 %v1025_v30, %v1007_v52 }
 0x2cb   : > { %v1037_v31 = vpop.f32.mrf.mxu0  ;;  %v1058_v33 = vpop.f32.mrf.mxu1 }
 0x2cc   : > { %v1091_v34 = vadd.f32 %v1284_v4, %v1026_v13  ;;  %v1038_v35 = vadd.f32 %v1037_v31, %v918_v53 }
 0x2cd   : > { %v1077_v5 = vpop.f32.mrf.mxu3 }
 0x2ce   : > { %v1099_v40 = vmax.f32 %v1091_v34, 0.0  ;;  %v1057_v37 = vadd.f32 %v1056_v22, %v1038_v35 }
 0x2d0   : > { %1107 = vst [vmem:[%s1933_s21 + $0x30] sm:$0xff] %v1099_v40  ;;  %v1076_v24 = vadd.f32 %v1075_v28, %v1057_v37 }
 0x2d2   : > { %v1042_v19 = vpop.f32.mrf.mxu2  ;;  %v1086_v44 = vadd.f32 %v1285_v25, %v1076_v24 }
 0x2d3   : > { %v1043_v58 = vadd.f32 %v1042_v19, %v928_v6  ;;  %v1039_v23 = vpop.f32.mrf.mxu0  ;;  %v1061_v41 = vpop.f32.mrf.mxu1 }
 0x2d4   : > { %v1094_v48 = vmax.f32 %v1086_v44, 0.0  ;;  %v1040_v10 = vadd.f32 %v1039_v23, %v923_v51  ;;  %v1288_v51 = vld [vmem:[%s1352_s23 + $0x38] sm:$0xff] }
 0x2d5   : > { %v1062_v7 = vadd.f32 %v1061_v41, %v1043_v58  ;;  %v1080_v49 = vpop.f32.mrf.mxu3 }
 0x2d6   : > { %1102 = vst [vmem:[%s1933_s21 + $0x8] sm:$0xff] %v1094_v48  ;;  %v1059_v32 = vadd.f32 %v1058_v33, %v1040_v10 }
 0x2d7   : > { %v1081_v20 = vadd.f32 %v1080_v49, %v1062_v7 }
 0x2d8   : > { %v1078_v45 = vadd.f32 %v1077_v5, %v1059_v32 }
 0x2d9   : > { %v1090_v54 = vadd.f32 %v1286_v42, %v1081_v20 }
 0x2da   : > { %v1044_v36 = vpop.f32.mrf.mxu2  ;;  %v1088_v39 = vadd.f32 %v1287_v43, %v1078_v45 }
 0x2db   : > { %v1098_v53 = vmax.f32 %v1090_v54, 0.0  ;;  %v1045_v55 = vadd.f32 %v1044_v36, %v933_v38  ;;  %v1063_v14 = vpop.f32.mrf.mxu1 }
 0x2dc   : > { %v1096_v56 = vmax.f32 %v1088_v39, 0.0 }
 0x2dd   : > { %1106 = vst [vmem:[%s1933_s21 + $0x28] sm:$0xff] %v1098_v53  ;;  %v1064_v50 = vadd.f32 %v1063_v14, %v1045_v55  ;;  %v1082_v46 = vpop.f32.mrf.mxu3 }
 0x2de   : > { %1104 = vst [vmem:[%s1933_s21 + $0x18] sm:$0xff] %v1096_v56 }
 0x2df   : > { %v1083_v9 = vadd.f32 %v1082_v46, %v1064_v50 }
 0x2e1   : > { %v1092_v59 = vadd.f32 %v1288_v51, %v1083_v9 }
 0x2e3   : > { %v1100_v60 = vmax.f32 %v1092_v59, 0.0 }
 0x2e5   : > { %1108 = vst [vmem:[%s1933_s21 + $0x38] sm:$0xff] %v1100_v60 }
 0x2e6 PF: > { %s15_s18 = sadd.s32 1, %s1295_s18  }
 0x2e7   : > { %p12_p4 = scmp.ge.s32.totalorder %s15_s18, 4  }
 0x2e9   :  { %14 = sbr.rel (!%p12_p4) target bundleno = 1 (0x1), region = 70 }

</bundles_post_ra>
